<compile_context>
chip_gen: v5e
topology: v5e:2x2
jax: 0.10.0
libtpu: 0.0.40
codegen_flags: <defaults>
</compile_context>

<pallas_src>
import jax
import jax.numpy as jnp
import numpy as np
from jax import lax
from jax.experimental import pallas as pl
from jax.experimental.pallas import tpu as pltpu

EPS = 1e-5


def _out_hw(size, stride):
    # kernel=3, padding=1 (PyTorch ConvFixedPadding)
    return (size + 2 - 3) // stride + 1


# ------------------------------ Pallas kernel --------------------------------
def _make_stem_kernel(c1, c2, c3, gw, m, m4):
    """c1/c2/c3: input-channel counts of layers 2/3/4; gw: width of the stride-1
    working grid; m: flattened N*H1*W1 lane count of layers 1-3; m4: true
    (unpadded) element count of the layer-4 output (for BN statistics)."""

    def bn_relu(pre, g_ref, b_ref, count, out_mask=None):
        # Two-pass batch stats -> folded scale/bias FMA -> ReLU.
        inv = 1.0 / count
        mean = jnp.sum(pre, axis=1, keepdims=True) * inv
        cen = pre - mean
        cen_stat = cen if out_mask is None else cen * out_mask
        var = jnp.sum(cen_stat * cen_stat, axis=1, keepdims=True) * inv
        scale = g_ref[...] * lax.rsqrt(var + EPS)
        act = jnp.maximum(cen * scale + b_ref[...], 0.0)
        return act if out_mask is None else act * out_mask

    def kernel(xcol_ref, masks_ref, d4_ref, omask_ref,
               w1_ref, w2_ref, w3_ref, w4_ref,
               g1_ref, b1_ref, g2_ref, b2_ref,
               g3_ref, b3_ref, g4_ref, b4_ref,
               o_ref, col_ref):

        def conv3x3_s1(act, w_ref, cin):
            # 3x3 / stride-1 conv on the flattened (cin, m) activation:
            # 9 lane-rolled + border-masked tap copies stacked into the VMEM
            # scratch, then ONE (cout, 9*cin) x (9*cin, m) MXU matmul.
            for k in range(9):
                dh, dw = k // 3 - 1, k % 3 - 1
                if dh == 0 and dw == 0:
                    col_ref[pl.ds(k * cin, cin), :] = act
                else:
                    shift = (-(dh * gw + dw)) % m        # out[x] = act[x + d]
                    col_ref[pl.ds(k * cin, cin), :] = (
                        pltpu.roll(act, shift, axis=1) * masks_ref[k])
            return jnp.dot(w_ref[...], col_ref[pl.ds(0, 9 * cin), :],
                           preferred_element_type=jnp.float32)

        # Layer 1 (3 -> c, stride 2): input im2col'd on the host -> one matmul.
        a = bn_relu(jnp.dot(w1_ref[...], xcol_ref[...],
                            preferred_element_type=jnp.float32),
                    g1_ref, b1_ref, m)
        # Layer 2 (c -> c, stride 1)
        a = bn_relu(conv3x3_s1(a, w2_ref, c1), g2_ref, b2_ref, m)
        # Layer 3 (c -> 2c, stride 1)
        a = bn_relu(conv3x3_s1(a, w3_ref, c2), g3_ref, b3_ref, m)
        # Layer 4 (2c -> 2c, stride 2): stride-1 conv at full grid resolution,
        # then one small 0/1 downsample matmul onto a lane-dense output; BN
        # statistics masked to the m4 real columns.
        pre = jnp.dot(conv3x3_s1(a, w4_ref, c3), d4_ref[...],
                      preferred_element_type=jnp.float32)
        o_ref[...] = bn_relu(pre, g4_ref, b4_ref, m4, out_mask=omask_ref[...])

    return kernel


# --------------------------- host-side const prep ----------------------------
def _build_shift_masks(n, gh, gw):
    """(9, 1, n*gh*gw) 0/1 masks: tap k = kh*3+kw is valid at (h, w) iff the
    source (h+kh-1, w+kw-1) stays inside the gh x gw grid (same batch)."""
    m = n * gh * gw
    masks = np.zeros((9, 1, m), np.float32)
    base = np.arange(n) * gh * gw
    for k in range(9):
        dh, dw = k // 3 - 1, k % 3 - 1
        for h in range(gh):
            if not 0 <= h + dh < gh:
                continue
            for w in range(gw):
                if 0 <= w + dw < gw:
                    masks[k, 0, base + h * gw + w] = 1.0
    return jnp.asarray(masks)


def _build_downsample(n, gh, gw, stride, m_pad):
    """(n*gh*gw, m_pad) 0/1 matrix picking the stride-2 output positions out of
    the full-resolution stride-1 conv output, plus the (1, m_pad) column mask."""
    oh, ow = _out_hw(gh, stride), _out_hw(gw, stride)
    m_out = n * oh * ow
    d = np.zeros((n * gh * gw, m_pad), np.float32)
    omask = np.zeros((1, m_pad), np.float32)
    omask[0, :m_out] = 1.0
    for b in range(n):
        for i in range(oh):
            for j in range(ow):
                d[(b * gh + i * stride) * gw + j * stride,
                  (b * oh + i) * ow + j] = 1.0
    return jnp.asarray(d), jnp.asarray(omask), m_out, oh, ow


def _wcat(w_hwio):
    """(3,3,Cin,Cout) HWIO -> (Cout, 9*Cin); column index = (kh*3+kw)*Cin + ci."""
    kh, kw, cin, cout = w_hwio.shape
    return jnp.transpose(w_hwio.reshape(kh * kw * cin, cout)).astype(jnp.float32)


def _im2col_stride2(x_nchw, ho, wo, stride):
    """(N,C,H,W) -> (9*C, N*ho*wo) patches of the zero-padded input; a tiny
    one-time transform of the network input done by XLA outside the kernel."""
    n, c, _, _ = x_nchw.shape
    xp = jnp.pad(x_nchw, ((0, 0), (0, 0), (1, 1), (1, 1)))
    taps = []
    for kh in range(3):
        for kw in range(3):
            taps.append(lax.slice(
                xp, (0, 0, kh, kw),
                (n, c, kh + stride * (ho - 1) + 1, kw + stride * (wo - 1) + 1),
                (1, 1, stride, stride)))
    patches = jnp.stack(taps, axis=0)                        # (9, N, C, ho, wo)
    return patches.transpose(0, 2, 1, 3, 4).reshape(9 * c, n * ho * wo)


# ------------------------------- forward pass ---------------------------------
def make_stem_forward(params, n, h, w):
    (wt1, g1, b1, s1), (wt2, g2, b2, s2), (wt3, g3, b3, s3), (wt4, g4, b4, s4) = params
    assert (s1, s2, s3, s4) == (2, 1, 1, 2)
    cin0 = wt1.shape[2]
    c1, c2, c3, c4 = wt1.shape[3], wt2.shape[3], wt3.shape[3], wt4.shape[3]

    h1, w1 = _out_hw(h, s1), _out_hw(w, s1)          # stride-1 working grid
    m = n * h1 * w1                                   # lane count, layers 1-3
    h4, w4 = _out_hw(h1, s4), _out_hw(w1, s4)
    m4 = n * h4 * w4
    m_pad = max(128, -(-m4 // 128) * 128)             # lane-dense output width

    masks = _build_shift_masks(n, h1, w1)
    d4, omask, m4_chk, _, _ = _build_downsample(n, h1, w1, s4, m_pad)
    assert m4_chk == m4

    col = lambda v: v.reshape(-1, 1).astype(jnp.float32)
    consts = (masks, d4, omask,
              _wcat(wt1), _wcat(wt2), _wcat(wt3), _wcat(wt4),
              col(g1), col(b1), col(g2), col(b2), col(g3), col(b3), col(g4), col(b4))

    col_rows = 9 * max(c1, c2, c3)                    # shared tap-stack scratch
    xcol_rows = 9 * cin0

    # Truthful cost estimate: one matmul per layer + the layer-4 downsample.
    flops = 2 * m * (c1 * xcol_rows + c2 * 9 * c1 + c3 * 9 * c2 + c4 * 9 * c3) \
        + 2 * c4 * m * m_pad
    trans = c1 + c2 + c3 + c4                          # one rsqrt per channel
    const_bytes = sum(int(np.prod(a.shape)) * 4 for a in consts)
    bytes_accessed = const_bytes + xcol_rows * m * 4 + c4 * m_pad * 4

    # Everything is resident in VMEM for the single fused invocation.
    resident = bytes_accessed + col_rows * m * 4
    vmem_limit = 2 * resident + (8 << 20)

    kernel = _make_stem_kernel(c1, c2, c3, w1, m, m4)
    vmem = pl.BlockSpec(memory_space=pltpu.MemorySpace.VMEM)

    @jax.jit
    def forward(x):
        xcol = _im2col_stride2(x, h1, w1, s1).astype(jnp.float32)
        out = pl.pallas_call(
            kernel,
            out_shape=jax.ShapeDtypeStruct((c4, m_pad), jnp.float32),
            in_specs=[vmem] * (1 + len(consts)),
            out_specs=vmem,
            scratch_shapes=[pltpu.VMEM((col_rows, m), jnp.float32)],
            compiler_params=pltpu.CompilerParams(vmem_limit_bytes=vmem_limit),
            cost_estimate=pl.CostEstimate(flops=flops, transcendentals=trans,
                                          bytes_accessed=bytes_accessed),
        )(xcol, *consts)
        # (C4, m_pad) -> drop lane padding -> NCHW
        return out[:, :m4].reshape(c4, n, h4, w4).transpose(1, 0, 2, 3)

    return forward


# --------------------------- pure-JAX reference -------------------------------
def stem_block_ref(x_nchw, params):
    y = jnp.transpose(x_nchw, (0, 2, 3, 1))
    for wt, g, b, stride in params:
        y = lax.conv_general_dilated(
            y, wt, window_strides=(stride, stride), padding=((1, 1), (1, 1)),
            dimension_numbers=("NHWC", "HWIO", "NHWC"))
        mean = jnp.mean(y, axis=(0, 1, 2), keepdims=True)
        var = jnp.mean((y - mean) ** 2, axis=(0, 1, 2), keepdims=True)
        y = (y - mean) * lax.rsqrt(var + EPS) * g + b
        y = jnp.maximum(y, 0.0)
    return jnp.transpose(y, (0, 3, 1, 2))


# ------------------------------ param init -----------------------------------
def init_params(key, channel_intermediate):
    ci = channel_intermediate
    co = 2 * ci
    layer_defs = [(3, ci, 2), (ci, ci, 1), (ci, co, 1), (co, co, 2)]
    params = []
    for cin, cout, stride in layer_defs:
        key, kw_, kg_, kb_ = jax.random.split(key, 4)
        wt = 0.1 * jax.random.normal(kw_, (3, 3, cin, cout), jnp.float32)   # HWIO
        gamma = 1.0 + 0.1 * jax.random.normal(kg_, (cout,), jnp.float32)
        beta = 0.1 * jax.random.normal(kb_, (cout,), jnp.float32)
        params.append((wt, gamma, beta, stride))
    return params


# --------------------------------- main ---------------------------------------
if __name__ == "__main__":
    key = jax.random.PRNGKey(0)
    key, kx = jax.random.split(key)

    channel_intermediate = 8
    N, C, H, W = 2, 3, 16, 16
    x = jax.random.normal(kx, (N, C, H, W), jnp.float32)   # NCHW, like PyTorch
    params = init_params(key, channel_intermediate)

    forward = make_stem_forward(params, N, H, W)
    out = jax.block_until_ready(forward(x))
    ref = jax.block_until_ready(stem_block_ref(x, params))

    assert out.shape == (N, 2 * channel_intermediate, H // 4, W // 4), out.shape
    assert jnp.allclose(out, ref, rtol=1e-4, atol=1e-4), \
        f"max abs diff {jnp.max(jnp.abs(out - ref))}"

    print("KERNEL_OK")
</pallas_src>

<mosaic_0001>
module attributes {stable_mosaic.version = 11 : i64} {
  func.func @kernel(%arg0: memref<27x128xf32, #tpu.memory_space<vmem>>, %arg1: memref<9x1x128xf32, #tpu.memory_space<vmem>>, %arg2: memref<128x128xf32, #tpu.memory_space<vmem>>, %arg3: memref<1x128xf32, #tpu.memory_space<vmem>>, %arg4: memref<8x27xf32, #tpu.memory_space<vmem>>, %arg5: memref<8x72xf32, #tpu.memory_space<vmem>>, %arg6: memref<16x72xf32, #tpu.memory_space<vmem>>, %arg7: memref<16x144xf32, #tpu.memory_space<vmem>>, %arg8: memref<8x1xf32, #tpu.memory_space<vmem>>, %arg9: memref<8x1xf32, #tpu.memory_space<vmem>>, %arg10: memref<8x1xf32, #tpu.memory_space<vmem>>, %arg11: memref<8x1xf32, #tpu.memory_space<vmem>>, %arg12: memref<16x1xf32, #tpu.memory_space<vmem>>, %arg13: memref<16x1xf32, #tpu.memory_space<vmem>>, %arg14: memref<16x1xf32, #tpu.memory_space<vmem>>, %arg15: memref<16x1xf32, #tpu.memory_space<vmem>>, %arg16: memref<16x128xf32, #tpu.memory_space<vmem>>, %arg17: memref<144x128xf32, #tpu.memory_space<vmem>>) attributes {dimension_semantics = [], scalar_prefetch = 0 : i64, scratch_operands = 1 : i64, tpu.core_type = #tpu.core_type<tc>} {
    %c0 = arith.constant 0 : index
    %c0_0 = arith.constant 0 : index
    %0 = vector.load %arg4[%c0, %c0_0] : memref<8x27xf32, #tpu.memory_space<vmem>>, vector<8x27xf32>
    %c0_1 = arith.constant 0 : index
    %c0_2 = arith.constant 0 : index
    %1 = vector.load %arg0[%c0_1, %c0_2] : memref<27x128xf32, #tpu.memory_space<vmem>>, vector<27x128xf32>
    %cst = arith.constant dense<0.000000e+00> : vector<8x128xf32>
    %2 = tpu.matmul %0, %1, %cst {dimension_numbers = #tpu.dot_dimension_numbers<[1], [0], [0], [1], [0, 0, 1, 1], [], []>} : vector<8x27xf32>, vector<27x128xf32>, vector<8x128xf32> -> vector<8x128xf32>
    %cst_3 = arith.constant dense<0.000000e+00> : vector<8xf32>
    %3 = vector.multi_reduction <add>, %2, %cst_3 [1] : vector<8x128xf32> to vector<8xf32>
    %4 = vector.shape_cast %3 : vector<8xf32> to vector<8x1xf32>
    %cst_4 = arith.constant 7.812500e-03 : f32
    %5 = vector.broadcast %cst_4 : f32 to vector<8x1xf32>
    %6 = arith.mulf %4, %5 : vector<8x1xf32>
    %7 = vector.broadcast %6 : vector<8x1xf32> to vector<8x128xf32>
    %8 = arith.subf %2, %7 : vector<8x128xf32>
    %9 = arith.mulf %8, %8 : vector<8x128xf32>
    %cst_5 = arith.constant dense<0.000000e+00> : vector<8xf32>
    %10 = vector.multi_reduction <add>, %9, %cst_5 [1] : vector<8x128xf32> to vector<8xf32>
    %11 = vector.shape_cast %10 : vector<8xf32> to vector<8x1xf32>
    %cst_6 = arith.constant 7.812500e-03 : f32
    %12 = vector.broadcast %cst_6 : f32 to vector<8x1xf32>
    %13 = arith.mulf %11, %12 : vector<8x1xf32>
    %c0_7 = arith.constant 0 : index
    %c0_8 = arith.constant 0 : index
    %14 = vector.load %arg8[%c0_7, %c0_8] : memref<8x1xf32, #tpu.memory_space<vmem>>, vector<8x1xf32>
    %cst_9 = arith.constant 9.99999974E-6 : f32
    %15 = vector.broadcast %cst_9 : f32 to vector<8x1xf32>
    %16 = arith.addf %13, %15 : vector<8x1xf32>
    %17 = math.rsqrt %16 : vector<8x1xf32>
    %18 = arith.mulf %14, %17 : vector<8x1xf32>
    %19 = vector.broadcast %18 : vector<8x1xf32> to vector<8x128xf32>
    %20 = arith.mulf %8, %19 : vector<8x128xf32>
    %c0_10 = arith.constant 0 : index
    %c0_11 = arith.constant 0 : index
    %21 = vector.load %arg9[%c0_10, %c0_11] : memref<8x1xf32, #tpu.memory_space<vmem>>, vector<8x1xf32>
    %22 = vector.broadcast %21 : vector<8x1xf32> to vector<8x128xf32>
    %23 = arith.addf %20, %22 : vector<8x128xf32>
    %cst_12 = arith.constant 0.000000e+00 : f32
    %24 = vector.broadcast %cst_12 : f32 to vector<8x128xf32>
    %25 = arith.maximumf %23, %24 : vector<8x128xf32>
    %c9_i32 = arith.constant 9 : i32
    %26 = tpu.dynamic_rotate %25 by %c9_i32 dim 1 : vector<8x128xf32>, i32 -> vector<8x128xf32>
    %c0_13 = arith.constant 0 : index
    %c0_14 = arith.constant 0 : index
    %c0_15 = arith.constant 0 : index
    %27 = vector.load %arg1[%c0_13, %c0_14, %c0_15] : memref<9x1x128xf32, #tpu.memory_space<vmem>>, vector<1x1x128xf32>
    %28 = vector.shape_cast %27 : vector<1x1x128xf32> to vector<1x128xf32>
    %29 = vector.broadcast %28 : vector<1x128xf32> to vector<8x128xf32>
    %30 = arith.mulf %26, %29 : vector<8x128xf32>
    %c0_16 = arith.constant 0 : index
    %c0_17 = arith.constant 0 : index
    %31 = vector.load %arg17[%c0_16, %c0_17] : memref<144x128xf32, #tpu.memory_space<vmem>>, vector<8x128xf32>
    tpu.vector_store %arg17[%c0_16, %c0_17], %30 {strides = array<i32>} : memref<144x128xf32, #tpu.memory_space<vmem>>, vector<8x128xf32>,
    %c8_i32 = arith.constant 8 : i32
    %32 = tpu.dynamic_rotate %25 by %c8_i32 dim 1 : vector<8x128xf32>, i32 -> vector<8x128xf32>
    %c1 = arith.constant 1 : index
    %c0_18 = arith.constant 0 : index
    %c0_19 = arith.constant 0 : index
    %33 = vector.load %arg1[%c1, %c0_18, %c0_19] : memref<9x1x128xf32, #tpu.memory_space<vmem>>, vector<1x1x128xf32>
    %34 = vector.shape_cast %33 : vector<1x1x128xf32> to vector<1x128xf32>
    %35 = vector.broadcast %34 : vector<1x128xf32> to vector<8x128xf32>
    %36 = arith.mulf %32, %35 : vector<8x128xf32>
    %c8 = arith.constant 8 : index
    %c0_20 = arith.constant 0 : index
    %37 = vector.load %arg17[%c8, %c0_20] : memref<144x128xf32, #tpu.memory_space<vmem>>, vector<8x128xf32>
    tpu.vector_store %arg17[%c8, %c0_20], %36 {strides = array<i32>} : memref<144x128xf32, #tpu.memory_space<vmem>>, vector<8x128xf32>,
    %c7_i32 = arith.constant 7 : i32
    %38 = tpu.dynamic_rotate %25 by %c7_i32 dim 1 : vector<8x128xf32>, i32 -> vector<8x128xf32>
    %c2 = arith.constant 2 : index
    %c0_21 = arith.constant 0 : index
    %c0_22 = arith.constant 0 : index
    %39 = vector.load %arg1[%c2, %c0_21, %c0_22] : memref<9x1x128xf32, #tpu.memory_space<vmem>>, vector<1x1x128xf32>
    %40 = vector.shape_cast %39 : vector<1x1x128xf32> to vector<1x128xf32>
    %41 = vector.broadcast %40 : vector<1x128xf32> to vector<8x128xf32>
    %42 = arith.mulf %38, %41 : vector<8x128xf32>
    %c16 = arith.constant 16 : index
    %c0_23 = arith.constant 0 : index
    %43 = vector.load %arg17[%c16, %c0_23] : memref<144x128xf32, #tpu.memory_space<vmem>>, vector<8x128xf32>
    tpu.vector_store %arg17[%c16, %c0_23], %42 {strides = array<i32>} : memref<144x128xf32, #tpu.memory_space<vmem>>, vector<8x128xf32>,
    %c1_i32 = arith.constant 1 : i32
    %44 = tpu.dynamic_rotate %25 by %c1_i32 dim 1 : vector<8x128xf32>, i32 -> vector<8x128xf32>
    %c3 = arith.constant 3 : index
    %c0_24 = arith.constant 0 : index
    %c0_25 = arith.constant 0 : index
    %45 = vector.load %arg1[%c3, %c0_24, %c0_25] : memref<9x1x128xf32, #tpu.memory_space<vmem>>, vector<1x1x128xf32>
    %46 = vector.shape_cast %45 : vector<1x1x128xf32> to vector<1x128xf32>
    %47 = vector.broadcast %46 : vector<1x128xf32> to vector<8x128xf32>
    %48 = arith.mulf %44, %47 : vector<8x128xf32>
    %c24 = arith.constant 24 : index
    %c0_26 = arith.constant 0 : index
    %49 = vector.load %arg17[%c24, %c0_26] : memref<144x128xf32, #tpu.memory_space<vmem>>, vector<8x128xf32>
    tpu.vector_store %arg17[%c24, %c0_26], %48 {strides = array<i32>} : memref<144x128xf32, #tpu.memory_space<vmem>>, vector<8x128xf32>,
    %c32 = arith.constant 32 : index
    %c0_27 = arith.constant 0 : index
    %50 = vector.load %arg17[%c32, %c0_27] : memref<144x128xf32, #tpu.memory_space<vmem>>, vector<8x128xf32>
    tpu.vector_store %arg17[%c32, %c0_27], %25 {strides = array<i32>} : memref<144x128xf32, #tpu.memory_space<vmem>>, vector<8x128xf32>,
    %c127_i32 = arith.constant 127 : i32
    %51 = tpu.dynamic_rotate %25 by %c127_i32 dim 1 : vector<8x128xf32>, i32 -> vector<8x128xf32>
    %c5 = arith.constant 5 : index
    %c0_28 = arith.constant 0 : index
    %c0_29 = arith.constant 0 : index
    %52 = vector.load %arg1[%c5, %c0_28, %c0_29] : memref<9x1x128xf32, #tpu.memory_space<vmem>>, vector<1x1x128xf32>
    %53 = vector.shape_cast %52 : vector<1x1x128xf32> to vector<1x128xf32>
    %54 = vector.broadcast %53 : vector<1x128xf32> to vector<8x128xf32>
    %55 = arith.mulf %51, %54 : vector<8x128xf32>
    %c40 = arith.constant 40 : index
    %c0_30 = arith.constant 0 : index
    %56 = vector.load %arg17[%c40, %c0_30] : memref<144x128xf32, #tpu.memory_space<vmem>>, vector<8x128xf32>
    tpu.vector_store %arg17[%c40, %c0_30], %55 {strides = array<i32>} : memref<144x128xf32, #tpu.memory_space<vmem>>, vector<8x128xf32>,
    %c121_i32 = arith.constant 121 : i32
    %57 = tpu.dynamic_rotate %25 by %c121_i32 dim 1 : vector<8x128xf32>, i32 -> vector<8x128xf32>
    %c6 = arith.constant 6 : index
    %c0_31 = arith.constant 0 : index
    %c0_32 = arith.constant 0 : index
    %58 = vector.load %arg1[%c6, %c0_31, %c0_32] : memref<9x1x128xf32, #tpu.memory_space<vmem>>, vector<1x1x128xf32>
    %59 = vector.shape_cast %58 : vector<1x1x128xf32> to vector<1x128xf32>
    %60 = vector.broadcast %59 : vector<1x128xf32> to vector<8x128xf32>
    %61 = arith.mulf %57, %60 : vector<8x128xf32>
    %c48 = arith.constant 48 : index
    %c0_33 = arith.constant 0 : index
    %62 = vector.load %arg17[%c48, %c0_33] : memref<144x128xf32, #tpu.memory_space<vmem>>, vector<8x128xf32>
    tpu.vector_store %arg17[%c48, %c0_33], %61 {strides = array<i32>} : memref<144x128xf32, #tpu.memory_space<vmem>>, vector<8x128xf32>,
    %c120_i32 = arith.constant 120 : i32
    %63 = tpu.dynamic_rotate %25 by %c120_i32 dim 1 : vector<8x128xf32>, i32 -> vector<8x128xf32>
    %c7 = arith.constant 7 : index
    %c0_34 = arith.constant 0 : index
    %c0_35 = arith.constant 0 : index
    %64 = vector.load %arg1[%c7, %c0_34, %c0_35] : memref<9x1x128xf32, #tpu.memory_space<vmem>>, vector<1x1x128xf32>
    %65 = vector.shape_cast %64 : vector<1x1x128xf32> to vector<1x128xf32>
    %66 = vector.broadcast %65 : vector<1x128xf32> to vector<8x128xf32>
    %67 = arith.mulf %63, %66 : vector<8x128xf32>
    %c56 = arith.constant 56 : index
    %c0_36 = arith.constant 0 : index
    %68 = vector.load %arg17[%c56, %c0_36] : memref<144x128xf32, #tpu.memory_space<vmem>>, vector<8x128xf32>
    tpu.vector_store %arg17[%c56, %c0_36], %67 {strides = array<i32>} : memref<144x128xf32, #tpu.memory_space<vmem>>, vector<8x128xf32>,
    %c119_i32 = arith.constant 119 : i32
    %69 = tpu.dynamic_rotate %25 by %c119_i32 dim 1 : vector<8x128xf32>, i32 -> vector<8x128xf32>
    %c8_37 = arith.constant 8 : index
    %c0_38 = arith.constant 0 : index
    %c0_39 = arith.constant 0 : index
    %70 = vector.load %arg1[%c8_37, %c0_38, %c0_39] : memref<9x1x128xf32, #tpu.memory_space<vmem>>, vector<1x1x128xf32>
    %71 = vector.shape_cast %70 : vector<1x1x128xf32> to vector<1x128xf32>
    %72 = vector.broadcast %71 : vector<1x128xf32> to vector<8x128xf32>
    %73 = arith.mulf %69, %72 : vector<8x128xf32>
    %c64 = arith.constant 64 : index
    %c0_40 = arith.constant 0 : index
    %74 = vector.load %arg17[%c64, %c0_40] : memref<144x128xf32, #tpu.memory_space<vmem>>, vector<8x128xf32>
    tpu.vector_store %arg17[%c64, %c0_40], %73 {strides = array<i32>} : memref<144x128xf32, #tpu.memory_space<vmem>>, vector<8x128xf32>,
    %c0_41 = arith.constant 0 : index
    %c0_42 = arith.constant 0 : index
    %75 = vector.load %arg5[%c0_41, %c0_42] : memref<8x72xf32, #tpu.memory_space<vmem>>, vector<8x72xf32>
    %c0_43 = arith.constant 0 : index
    %c0_44 = arith.constant 0 : index
    %76 = vector.load %arg17[%c0_43, %c0_44] : memref<144x128xf32, #tpu.memory_space<vmem>>, vector<72x128xf32>
    %cst_45 = arith.constant dense<0.000000e+00> : vector<8x128xf32>
    %77 = tpu.matmul %75, %76, %cst_45 {dimension_numbers = #tpu.dot_dimension_numbers<[1], [0], [0], [1], [0, 0, 1, 1], [], []>} : vector<8x72xf32>, vector<72x128xf32>, vector<8x128xf32> -> vector<8x128xf32>
    %cst_46 = arith.constant dense<0.000000e+00> : vector<8xf32>
    %78 = vector.multi_reduction <add>, %77, %cst_46 [1] : vector<8x128xf32> to vector<8xf32>
    %79 = vector.shape_cast %78 : vector<8xf32> to vector<8x1xf32>
    %cst_47 = arith.constant 7.812500e-03 : f32
    %80 = vector.broadcast %cst_47 : f32 to vector<8x1xf32>
    %81 = arith.mulf %79, %80 : vector<8x1xf32>
    %82 = vector.broadcast %81 : vector<8x1xf32> to vector<8x128xf32>
    %83 = arith.subf %77, %82 : vector<8x128xf32>
    %84 = arith.mulf %83, %83 : vector<8x128xf32>
    %cst_48 = arith.constant dense<0.000000e+00> : vector<8xf32>
    %85 = vector.multi_reduction <add>, %84, %cst_48 [1] : vector<8x128xf32> to vector<8xf32>
    %86 = vector.shape_cast %85 : vector<8xf32> to vector<8x1xf32>
    %cst_49 = arith.constant 7.812500e-03 : f32
    %87 = vector.broadcast %cst_49 : f32 to vector<8x1xf32>
    %88 = arith.mulf %86, %87 : vector<8x1xf32>
    %c0_50 = arith.constant 0 : index
    %c0_51 = arith.constant 0 : index
    %89 = vector.load %arg10[%c0_50, %c0_51] : memref<8x1xf32, #tpu.memory_space<vmem>>, vector<8x1xf32>
    %cst_52 = arith.constant 9.99999974E-6 : f32
    %90 = vector.broadcast %cst_52 : f32 to vector<8x1xf32>
    %91 = arith.addf %88, %90 : vector<8x1xf32>
    %92 = math.rsqrt %91 : vector<8x1xf32>
    %93 = arith.mulf %89, %92 : vector<8x1xf32>
    %94 = vector.broadcast %93 : vector<8x1xf32> to vector<8x128xf32>
    %95 = arith.mulf %83, %94 : vector<8x128xf32>
    %c0_53 = arith.constant 0 : index
    %c0_54 = arith.constant 0 : index
    %96 = vector.load %arg11[%c0_53, %c0_54] : memref<8x1xf32, #tpu.memory_space<vmem>>, vector<8x1xf32>
    %97 = vector.broadcast %96 : vector<8x1xf32> to vector<8x128xf32>
    %98 = arith.addf %95, %97 : vector<8x128xf32>
    %cst_55 = arith.constant 0.000000e+00 : f32
    %99 = vector.broadcast %cst_55 : f32 to vector<8x128xf32>
    %100 = arith.maximumf %98, %99 : vector<8x128xf32>
    %c9_i32_56 = arith.constant 9 : i32
    %101 = tpu.dynamic_rotate %100 by %c9_i32_56 dim 1 : vector<8x128xf32>, i32 -> vector<8x128xf32>
    %c0_57 = arith.constant 0 : index
    %c0_58 = arith.constant 0 : index
    %c0_59 = arith.constant 0 : index
    %102 = vector.load %arg1[%c0_57, %c0_58, %c0_59] : memref<9x1x128xf32, #tpu.memory_space<vmem>>, vector<1x1x128xf32>
    %103 = vector.shape_cast %102 : vector<1x1x128xf32> to vector<1x128xf32>
    %104 = vector.broadcast %103 : vector<1x128xf32> to vector<8x128xf32>
    %105 = arith.mulf %101, %104 : vector<8x128xf32>
    %c0_60 = arith.constant 0 : index
    %c0_61 = arith.constant 0 : index
    %106 = vector.load %arg17[%c0_60, %c0_61] : memref<144x128xf32, #tpu.memory_space<vmem>>, vector<8x128xf32>
    tpu.vector_store %arg17[%c0_60, %c0_61], %105 {strides = array<i32>} : memref<144x128xf32, #tpu.memory_space<vmem>>, vector<8x128xf32>,
    %c8_i32_62 = arith.constant 8 : i32
    %107 = tpu.dynamic_rotate %100 by %c8_i32_62 dim 1 : vector<8x128xf32>, i32 -> vector<8x128xf32>
    %c1_63 = arith.constant 1 : index
    %c0_64 = arith.constant 0 : index
    %c0_65 = arith.constant 0 : index
    %108 = vector.load %arg1[%c1_63, %c0_64, %c0_65] : memref<9x1x128xf32, #tpu.memory_space<vmem>>, vector<1x1x128xf32>
    %109 = vector.shape_cast %108 : vector<1x1x128xf32> to vector<1x128xf32>
    %110 = vector.broadcast %109 : vector<1x128xf32> to vector<8x128xf32>
    %111 = arith.mulf %107, %110 : vector<8x128xf32>
    %c8_66 = arith.constant 8 : index
    %c0_67 = arith.constant 0 : index
    %112 = vector.load %arg17[%c8_66, %c0_67] : memref<144x128xf32, #tpu.memory_space<vmem>>, vector<8x128xf32>
    tpu.vector_store %arg17[%c8_66, %c0_67], %111 {strides = array<i32>} : memref<144x128xf32, #tpu.memory_space<vmem>>, vector<8x128xf32>,
    %c7_i32_68 = arith.constant 7 : i32
    %113 = tpu.dynamic_rotate %100 by %c7_i32_68 dim 1 : vector<8x128xf32>, i32 -> vector<8x128xf32>
    %c2_69 = arith.constant 2 : index
    %c0_70 = arith.constant 0 : index
    %c0_71 = arith.constant 0 : index
    %114 = vector.load %arg1[%c2_69, %c0_70, %c0_71] : memref<9x1x128xf32, #tpu.memory_space<vmem>>, vector<1x1x128xf32>
    %115 = vector.shape_cast %114 : vector<1x1x128xf32> to vector<1x128xf32>
    %116 = vector.broadcast %115 : vector<1x128xf32> to vector<8x128xf32>
    %117 = arith.mulf %113, %116 : vector<8x128xf32>
    %c16_72 = arith.constant 16 : index
    %c0_73 = arith.constant 0 : index
    %118 = vector.load %arg17[%c16_72, %c0_73] : memref<144x128xf32, #tpu.memory_space<vmem>>, vector<8x128xf32>
    tpu.vector_store %arg17[%c16_72, %c0_73], %117 {strides = array<i32>} : memref<144x128xf32, #tpu.memory_space<vmem>>, vector<8x128xf32>,
    %c1_i32_74 = arith.constant 1 : i32
    %119 = tpu.dynamic_rotate %100 by %c1_i32_74 dim 1 : vector<8x128xf32>, i32 -> vector<8x128xf32>
    %c3_75 = arith.constant 3 : index
    %c0_76 = arith.constant 0 : index
    %c0_77 = arith.constant 0 : index
    %120 = vector.load %arg1[%c3_75, %c0_76, %c0_77] : memref<9x1x128xf32, #tpu.memory_space<vmem>>, vector<1x1x128xf32>
    %121 = vector.shape_cast %120 : vector<1x1x128xf32> to vector<1x128xf32>
    %122 = vector.broadcast %121 : vector<1x128xf32> to vector<8x128xf32>
    %123 = arith.mulf %119, %122 : vector<8x128xf32>
    %c24_78 = arith.constant 24 : index
    %c0_79 = arith.constant 0 : index
    %124 = vector.load %arg17[%c24_78, %c0_79] : memref<144x128xf32, #tpu.memory_space<vmem>>, vector<8x128xf32>
    tpu.vector_store %arg17[%c24_78, %c0_79], %123 {strides = array<i32>} : memref<144x128xf32, #tpu.memory_space<vmem>>, vector<8x128xf32>,
    %c32_80 = arith.constant 32 : index
    %c0_81 = arith.constant 0 : index
    %125 = vector.load %arg17[%c32_80, %c0_81] : memref<144x128xf32, #tpu.memory_space<vmem>>, vector<8x128xf32>
    tpu.vector_store %arg17[%c32_80, %c0_81], %100 {strides = array<i32>} : memref<144x128xf32, #tpu.memory_space<vmem>>, vector<8x128xf32>,
    %c127_i32_82 = arith.constant 127 : i32
    %126 = tpu.dynamic_rotate %100 by %c127_i32_82 dim 1 : vector<8x128xf32>, i32 -> vector<8x128xf32>
    %c5_83 = arith.constant 5 : index
    %c0_84 = arith.constant 0 : index
    %c0_85 = arith.constant 0 : index
    %127 = vector.load %arg1[%c5_83, %c0_84, %c0_85] : memref<9x1x128xf32, #tpu.memory_space<vmem>>, vector<1x1x128xf32>
    %128 = vector.shape_cast %127 : vector<1x1x128xf32> to vector<1x128xf32>
    %129 = vector.broadcast %128 : vector<1x128xf32> to vector<8x128xf32>
    %130 = arith.mulf %126, %129 : vector<8x128xf32>
    %c40_86 = arith.constant 40 : index
    %c0_87 = arith.constant 0 : index
    %131 = vector.load %arg17[%c40_86, %c0_87] : memref<144x128xf32, #tpu.memory_space<vmem>>, vector<8x128xf32>
    tpu.vector_store %arg17[%c40_86, %c0_87], %130 {strides = array<i32>} : memref<144x128xf32, #tpu.memory_space<vmem>>, vector<8x128xf32>,
    %c121_i32_88 = arith.constant 121 : i32
    %132 = tpu.dynamic_rotate %100 by %c121_i32_88 dim 1 : vector<8x128xf32>, i32 -> vector<8x128xf32>
    %c6_89 = arith.constant 6 : index
    %c0_90 = arith.constant 0 : index
    %c0_91 = arith.constant 0 : index
    %133 = vector.load %arg1[%c6_89, %c0_90, %c0_91] : memref<9x1x128xf32, #tpu.memory_space<vmem>>, vector<1x1x128xf32>
    %134 = vector.shape_cast %133 : vector<1x1x128xf32> to vector<1x128xf32>
    %135 = vector.broadcast %134 : vector<1x128xf32> to vector<8x128xf32>
    %136 = arith.mulf %132, %135 : vector<8x128xf32>
    %c48_92 = arith.constant 48 : index
    %c0_93 = arith.constant 0 : index
    %137 = vector.load %arg17[%c48_92, %c0_93] : memref<144x128xf32, #tpu.memory_space<vmem>>, vector<8x128xf32>
    tpu.vector_store %arg17[%c48_92, %c0_93], %136 {strides = array<i32>} : memref<144x128xf32, #tpu.memory_space<vmem>>, vector<8x128xf32>,
    %c120_i32_94 = arith.constant 120 : i32
    %138 = tpu.dynamic_rotate %100 by %c120_i32_94 dim 1 : vector<8x128xf32>, i32 -> vector<8x128xf32>
    %c7_95 = arith.constant 7 : index
    %c0_96 = arith.constant 0 : index
    %c0_97 = arith.constant 0 : index
    %139 = vector.load %arg1[%c7_95, %c0_96, %c0_97] : memref<9x1x128xf32, #tpu.memory_space<vmem>>, vector<1x1x128xf32>
    %140 = vector.shape_cast %139 : vector<1x1x128xf32> to vector<1x128xf32>
    %141 = vector.broadcast %140 : vector<1x128xf32> to vector<8x128xf32>
    %142 = arith.mulf %138, %141 : vector<8x128xf32>
    %c56_98 = arith.constant 56 : index
    %c0_99 = arith.constant 0 : index
    %143 = vector.load %arg17[%c56_98, %c0_99] : memref<144x128xf32, #tpu.memory_space<vmem>>, vector<8x128xf32>
    tpu.vector_store %arg17[%c56_98, %c0_99], %142 {strides = array<i32>} : memref<144x128xf32, #tpu.memory_space<vmem>>, vector<8x128xf32>,
    %c119_i32_100 = arith.constant 119 : i32
    %144 = tpu.dynamic_rotate %100 by %c119_i32_100 dim 1 : vector<8x128xf32>, i32 -> vector<8x128xf32>
    %c8_101 = arith.constant 8 : index
    %c0_102 = arith.constant 0 : index
    %c0_103 = arith.constant 0 : index
    %145 = vector.load %arg1[%c8_101, %c0_102, %c0_103] : memref<9x1x128xf32, #tpu.memory_space<vmem>>, vector<1x1x128xf32>
    %146 = vector.shape_cast %145 : vector<1x1x128xf32> to vector<1x128xf32>
    %147 = vector.broadcast %146 : vector<1x128xf32> to vector<8x128xf32>
    %148 = arith.mulf %144, %147 : vector<8x128xf32>
    %c64_104 = arith.constant 64 : index
    %c0_105 = arith.constant 0 : index
    %149 = vector.load %arg17[%c64_104, %c0_105] : memref<144x128xf32, #tpu.memory_space<vmem>>, vector<8x128xf32>
    tpu.vector_store %arg17[%c64_104, %c0_105], %148 {strides = array<i32>} : memref<144x128xf32, #tpu.memory_space<vmem>>, vector<8x128xf32>,
    %c0_106 = arith.constant 0 : index
    %c0_107 = arith.constant 0 : index
    %150 = vector.load %arg6[%c0_106, %c0_107] : memref<16x72xf32, #tpu.memory_space<vmem>>, vector<16x72xf32>
    %c0_108 = arith.constant 0 : index
    %c0_109 = arith.constant 0 : index
    %151 = vector.load %arg17[%c0_108, %c0_109] : memref<144x128xf32, #tpu.memory_space<vmem>>, vector<72x128xf32>
    %cst_110 = arith.constant dense<0.000000e+00> : vector<16x128xf32>
    %152 = tpu.matmul %150, %151, %cst_110 {dimension_numbers = #tpu.dot_dimension_numbers<[1], [0], [0], [1], [0, 0, 1, 1], [], []>} : vector<16x72xf32>, vector<72x128xf32>, vector<16x128xf32> -> vector<16x128xf32>
    %cst_111 = arith.constant dense<0.000000e+00> : vector<16xf32>
    %153 = vector.multi_reduction <add>, %152, %cst_111 [1] : vector<16x128xf32> to vector<16xf32>
    %154 = vector.shape_cast %153 : vector<16xf32> to vector<16x1xf32>
    %cst_112 = arith.constant 7.812500e-03 : f32
    %155 = vector.broadcast %cst_112 : f32 to vector<16x1xf32>
    %156 = arith.mulf %154, %155 : vector<16x1xf32>
    %157 = vector.broadcast %156 : vector<16x1xf32> to vector<16x128xf32>
    %158 = arith.subf %152, %157 : vector<16x128xf32>
    %159 = arith.mulf %158, %158 : vector<16x128xf32>
    %cst_113 = arith.constant dense<0.000000e+00> : vector<16xf32>
    %160 = vector.multi_reduction <add>, %159, %cst_113 [1] : vector<16x128xf32> to vector<16xf32>
    %161 = vector.shape_cast %160 : vector<16xf32> to vector<16x1xf32>
    %cst_114 = arith.constant 7.812500e-03 : f32
    %162 = vector.broadcast %cst_114 : f32 to vector<16x1xf32>
    %163 = arith.mulf %161, %162 : vector<16x1xf32>
    %c0_115 = arith.constant 0 : index
    %c0_116 = arith.constant 0 : index
    %164 = vector.load %arg12[%c0_115, %c0_116] : memref<16x1xf32, #tpu.memory_space<vmem>>, vector<16x1xf32>
    %cst_117 = arith.constant 9.99999974E-6 : f32
    %165 = vector.broadcast %cst_117 : f32 to vector<16x1xf32>
    %166 = arith.addf %163, %165 : vector<16x1xf32>
    %167 = math.rsqrt %166 : vector<16x1xf32>
    %168 = arith.mulf %164, %167 : vector<16x1xf32>
    %169 = vector.broadcast %168 : vector<16x1xf32> to vector<16x128xf32>
    %170 = arith.mulf %158, %169 : vector<16x128xf32>
    %c0_118 = arith.constant 0 : index
    %c0_119 = arith.constant 0 : index
    %171 = vector.load %arg13[%c0_118, %c0_119] : memref<16x1xf32, #tpu.memory_space<vmem>>, vector<16x1xf32>
    %172 = vector.broadcast %171 : vector<16x1xf32> to vector<16x128xf32>
    %173 = arith.addf %170, %172 : vector<16x128xf32>
    %cst_120 = arith.constant 0.000000e+00 : f32
    %174 = vector.broadcast %cst_120 : f32 to vector<16x128xf32>
    %175 = arith.maximumf %173, %174 : vector<16x128xf32>
    %c9_i32_121 = arith.constant 9 : i32
    %176 = tpu.dynamic_rotate %175 by %c9_i32_121 dim 1 : vector<16x128xf32>, i32 -> vector<16x128xf32>
    %c0_122 = arith.constant 0 : index
    %c0_123 = arith.constant 0 : index
    %c0_124 = arith.constant 0 : index
    %177 = vector.load %arg1[%c0_122, %c0_123, %c0_124] : memref<9x1x128xf32, #tpu.memory_space<vmem>>, vector<1x1x128xf32>
    %178 = vector.shape_cast %177 : vector<1x1x128xf32> to vector<1x128xf32>
    %179 = vector.broadcast %178 : vector<1x128xf32> to vector<16x128xf32>
    %180 = arith.mulf %176, %179 : vector<16x128xf32>
    %c0_125 = arith.constant 0 : index
    %c0_126 = arith.constant 0 : index
    %181 = vector.load %arg17[%c0_125, %c0_126] : memref<144x128xf32, #tpu.memory_space<vmem>>, vector<16x128xf32>
    tpu.vector_store %arg17[%c0_125, %c0_126], %180 {strides = array<i32>} : memref<144x128xf32, #tpu.memory_space<vmem>>, vector<16x128xf32>,
    %c8_i32_127 = arith.constant 8 : i32
    %182 = tpu.dynamic_rotate %175 by %c8_i32_127 dim 1 : vector<16x128xf32>, i32 -> vector<16x128xf32>
    %c1_128 = arith.constant 1 : index
    %c0_129 = arith.constant 0 : index
    %c0_130 = arith.constant 0 : index
    %183 = vector.load %arg1[%c1_128, %c0_129, %c0_130] : memref<9x1x128xf32, #tpu.memory_space<vmem>>, vector<1x1x128xf32>
    %184 = vector.shape_cast %183 : vector<1x1x128xf32> to vector<1x128xf32>
    %185 = vector.broadcast %184 : vector<1x128xf32> to vector<16x128xf32>
    %186 = arith.mulf %182, %185 : vector<16x128xf32>
    %c16_131 = arith.constant 16 : index
    %c0_132 = arith.constant 0 : index
    %187 = vector.load %arg17[%c16_131, %c0_132] : memref<144x128xf32, #tpu.memory_space<vmem>>, vector<16x128xf32>
    tpu.vector_store %arg17[%c16_131, %c0_132], %186 {strides = array<i32>} : memref<144x128xf32, #tpu.memory_space<vmem>>, vector<16x128xf32>,
    %c7_i32_133 = arith.constant 7 : i32
    %188 = tpu.dynamic_rotate %175 by %c7_i32_133 dim 1 : vector<16x128xf32>, i32 -> vector<16x128xf32>
    %c2_134 = arith.constant 2 : index
    %c0_135 = arith.constant 0 : index
    %c0_136 = arith.constant 0 : index
    %189 = vector.load %arg1[%c2_134, %c0_135, %c0_136] : memref<9x1x128xf32, #tpu.memory_space<vmem>>, vector<1x1x128xf32>
    %190 = vector.shape_cast %189 : vector<1x1x128xf32> to vector<1x128xf32>
    %191 = vector.broadcast %190 : vector<1x128xf32> to vector<16x128xf32>
    %192 = arith.mulf %188, %191 : vector<16x128xf32>
    %c32_137 = arith.constant 32 : index
    %c0_138 = arith.constant 0 : index
    %193 = vector.load %arg17[%c32_137, %c0_138] : memref<144x128xf32, #tpu.memory_space<vmem>>, vector<16x128xf32>
    tpu.vector_store %arg17[%c32_137, %c0_138], %192 {strides = array<i32>} : memref<144x128xf32, #tpu.memory_space<vmem>>, vector<16x128xf32>,
    %c1_i32_139 = arith.constant 1 : i32
    %194 = tpu.dynamic_rotate %175 by %c1_i32_139 dim 1 : vector<16x128xf32>, i32 -> vector<16x128xf32>
    %c3_140 = arith.constant 3 : index
    %c0_141 = arith.constant 0 : index
    %c0_142 = arith.constant 0 : index
    %195 = vector.load %arg1[%c3_140, %c0_141, %c0_142] : memref<9x1x128xf32, #tpu.memory_space<vmem>>, vector<1x1x128xf32>
    %196 = vector.shape_cast %195 : vector<1x1x128xf32> to vector<1x128xf32>
    %197 = vector.broadcast %196 : vector<1x128xf32> to vector<16x128xf32>
    %198 = arith.mulf %194, %197 : vector<16x128xf32>
    %c48_143 = arith.constant 48 : index
    %c0_144 = arith.constant 0 : index
    %199 = vector.load %arg17[%c48_143, %c0_144] : memref<144x128xf32, #tpu.memory_space<vmem>>, vector<16x128xf32>
    tpu.vector_store %arg17[%c48_143, %c0_144], %198 {strides = array<i32>} : memref<144x128xf32, #tpu.memory_space<vmem>>, vector<16x128xf32>,
    %c64_145 = arith.constant 64 : index
    %c0_146 = arith.constant 0 : index
    %200 = vector.load %arg17[%c64_145, %c0_146] : memref<144x128xf32, #tpu.memory_space<vmem>>, vector<16x128xf32>
    tpu.vector_store %arg17[%c64_145, %c0_146], %175 {strides = array<i32>} : memref<144x128xf32, #tpu.memory_space<vmem>>, vector<16x128xf32>,
    %c127_i32_147 = arith.constant 127 : i32
    %201 = tpu.dynamic_rotate %175 by %c127_i32_147 dim 1 : vector<16x128xf32>, i32 -> vector<16x128xf32>
    %c5_148 = arith.constant 5 : index
    %c0_149 = arith.constant 0 : index
    %c0_150 = arith.constant 0 : index
    %202 = vector.load %arg1[%c5_148, %c0_149, %c0_150] : memref<9x1x128xf32, #tpu.memory_space<vmem>>, vector<1x1x128xf32>
    %203 = vector.shape_cast %202 : vector<1x1x128xf32> to vector<1x128xf32>
    %204 = vector.broadcast %203 : vector<1x128xf32> to vector<16x128xf32>
    %205 = arith.mulf %201, %204 : vector<16x128xf32>
    %c80 = arith.constant 80 : index
    %c0_151 = arith.constant 0 : index
    %206 = vector.load %arg17[%c80, %c0_151] : memref<144x128xf32, #tpu.memory_space<vmem>>, vector<16x128xf32>
    tpu.vector_store %arg17[%c80, %c0_151], %205 {strides = array<i32>} : memref<144x128xf32, #tpu.memory_space<vmem>>, vector<16x128xf32>,
    %c121_i32_152 = arith.constant 121 : i32
    %207 = tpu.dynamic_rotate %175 by %c121_i32_152 dim 1 : vector<16x128xf32>, i32 -> vector<16x128xf32>
    %c6_153 = arith.constant 6 : index
    %c0_154 = arith.constant 0 : index
    %c0_155 = arith.constant 0 : index
    %208 = vector.load %arg1[%c6_153, %c0_154, %c0_155] : memref<9x1x128xf32, #tpu.memory_space<vmem>>, vector<1x1x128xf32>
    %209 = vector.shape_cast %208 : vector<1x1x128xf32> to vector<1x128xf32>
    %210 = vector.broadcast %209 : vector<1x128xf32> to vector<16x128xf32>
    %211 = arith.mulf %207, %210 : vector<16x128xf32>
    %c96 = arith.constant 96 : index
    %c0_156 = arith.constant 0 : index
    %212 = vector.load %arg17[%c96, %c0_156] : memref<144x128xf32, #tpu.memory_space<vmem>>, vector<16x128xf32>
    tpu.vector_store %arg17[%c96, %c0_156], %211 {strides = array<i32>} : memref<144x128xf32, #tpu.memory_space<vmem>>, vector<16x128xf32>,
    %c120_i32_157 = arith.constant 120 : i32
    %213 = tpu.dynamic_rotate %175 by %c120_i32_157 dim 1 : vector<16x128xf32>, i32 -> vector<16x128xf32>
    %c7_158 = arith.constant 7 : index
    %c0_159 = arith.constant 0 : index
    %c0_160 = arith.constant 0 : index
    %214 = vector.load %arg1[%c7_158, %c0_159, %c0_160] : memref<9x1x128xf32, #tpu.memory_space<vmem>>, vector<1x1x128xf32>
    %215 = vector.shape_cast %214 : vector<1x1x128xf32> to vector<1x128xf32>
    %216 = vector.broadcast %215 : vector<1x128xf32> to vector<16x128xf32>
    %217 = arith.mulf %213, %216 : vector<16x128xf32>
    %c112 = arith.constant 112 : index
    %c0_161 = arith.constant 0 : index
    %218 = vector.load %arg17[%c112, %c0_161] : memref<144x128xf32, #tpu.memory_space<vmem>>, vector<16x128xf32>
    tpu.vector_store %arg17[%c112, %c0_161], %217 {strides = array<i32>} : memref<144x128xf32, #tpu.memory_space<vmem>>, vector<16x128xf32>,
    %c119_i32_162 = arith.constant 119 : i32
    %219 = tpu.dynamic_rotate %175 by %c119_i32_162 dim 1 : vector<16x128xf32>, i32 -> vector<16x128xf32>
    %c8_163 = arith.constant 8 : index
    %c0_164 = arith.constant 0 : index
    %c0_165 = arith.constant 0 : index
    %220 = vector.load %arg1[%c8_163, %c0_164, %c0_165] : memref<9x1x128xf32, #tpu.memory_space<vmem>>, vector<1x1x128xf32>
    %221 = vector.shape_cast %220 : vector<1x1x128xf32> to vector<1x128xf32>
    %222 = vector.broadcast %221 : vector<1x128xf32> to vector<16x128xf32>
    %223 = arith.mulf %219, %222 : vector<16x128xf32>
    %c128 = arith.constant 128 : index
    %c0_166 = arith.constant 0 : index
    %224 = vector.load %arg17[%c128, %c0_166] : memref<144x128xf32, #tpu.memory_space<vmem>>, vector<16x128xf32>
    tpu.vector_store %arg17[%c128, %c0_166], %223 {strides = array<i32>} : memref<144x128xf32, #tpu.memory_space<vmem>>, vector<16x128xf32>,
    %c0_167 = arith.constant 0 : index
    %c0_168 = arith.constant 0 : index
    %225 = vector.load %arg7[%c0_167, %c0_168] : memref<16x144xf32, #tpu.memory_space<vmem>>, vector<16x144xf32>
    %c0_169 = arith.constant 0 : index
    %c0_170 = arith.constant 0 : index
    %226 = vector.load %arg17[%c0_169, %c0_170] : memref<144x128xf32, #tpu.memory_space<vmem>>, vector<144x128xf32>
    %cst_171 = arith.constant dense<0.000000e+00> : vector<16x128xf32>
    %227 = tpu.matmul %225, %226, %cst_171 {dimension_numbers = #tpu.dot_dimension_numbers<[1], [0], [0], [1], [0, 0, 1, 1], [], []>} : vector<16x144xf32>, vector<144x128xf32>, vector<16x128xf32> -> vector<16x128xf32>
    %c0_172 = arith.constant 0 : index
    %c0_173 = arith.constant 0 : index
    %228 = vector.load %arg2[%c0_172, %c0_173] : memref<128x128xf32, #tpu.memory_space<vmem>>, vector<128x128xf32>
    %cst_174 = arith.constant dense<0.000000e+00> : vector<16x128xf32>
    %229 = tpu.matmul %227, %228, %cst_174 {dimension_numbers = #tpu.dot_dimension_numbers<[1], [0], [0], [1], [0, 0, 1, 1], [], []>} : vector<16x128xf32>, vector<128x128xf32>, vector<16x128xf32> -> vector<16x128xf32>
    %c0_175 = arith.constant 0 : index
    %c0_176 = arith.constant 0 : index
    %230 = vector.load %arg3[%c0_175, %c0_176] : memref<1x128xf32, #tpu.memory_space<vmem>>, vector<1x128xf32>
    %cst_177 = arith.constant dense<0.000000e+00> : vector<16xf32>
    %231 = vector.multi_reduction <add>, %229, %cst_177 [1] : vector<16x128xf32> to vector<16xf32>
    %232 = vector.shape_cast %231 : vector<16xf32> to vector<16x1xf32>
    %cst_178 = arith.constant 3.125000e-02 : f32
    %233 = vector.broadcast %cst_178 : f32 to vector<16x1xf32>
    %234 = arith.mulf %232, %233 : vector<16x1xf32>
    %235 = vector.broadcast %234 : vector<16x1xf32> to vector<16x128xf32>
    %236 = arith.subf %229, %235 : vector<16x128xf32>
    %237 = vector.broadcast %230 : vector<1x128xf32> to vector<16x128xf32>
    %238 = arith.mulf %236, %237 : vector<16x128xf32>
    %239 = arith.mulf %238, %238 : vector<16x128xf32>
    %cst_179 = arith.constant dense<0.000000e+00> : vector<16xf32>
    %240 = vector.multi_reduction <add>, %239, %cst_179 [1] : vector<16x128xf32> to vector<16xf32>
    %241 = vector.shape_cast %240 : vector<16xf32> to vector<16x1xf32>
    %cst_180 = arith.constant 3.125000e-02 : f32
    %242 = vector.broadcast %cst_180 : f32 to vector<16x1xf32>
    %243 = arith.mulf %241, %242 : vector<16x1xf32>
    %c0_181 = arith.constant 0 : index
    %c0_182 = arith.constant 0 : index
    %244 = vector.load %arg14[%c0_181, %c0_182] : memref<16x1xf32, #tpu.memory_space<vmem>>, vector<16x1xf32>
    %cst_183 = arith.constant 9.99999974E-6 : f32
    %245 = vector.broadcast %cst_183 : f32 to vector<16x1xf32>
    %246 = arith.addf %243, %245 : vector<16x1xf32>
    %247 = math.rsqrt %246 : vector<16x1xf32>
    %248 = arith.mulf %244, %247 : vector<16x1xf32>
    %249 = vector.broadcast %248 : vector<16x1xf32> to vector<16x128xf32>
    %250 = arith.mulf %236, %249 : vector<16x128xf32>
    %c0_184 = arith.constant 0 : index
    %c0_185 = arith.constant 0 : index
    %251 = vector.load %arg15[%c0_184, %c0_185] : memref<16x1xf32, #tpu.memory_space<vmem>>, vector<16x1xf32>
    %252 = vector.broadcast %251 : vector<16x1xf32> to vector<16x128xf32>
    %253 = arith.addf %250, %252 : vector<16x128xf32>
    %cst_186 = arith.constant 0.000000e+00 : f32
    %254 = vector.broadcast %cst_186 : f32 to vector<16x128xf32>
    %255 = arith.maximumf %253, %254 : vector<16x128xf32>
    %256 = vector.broadcast %230 : vector<1x128xf32> to vector<16x128xf32>
    %257 = arith.mulf %255, %256 : vector<16x128xf32>
    %c0_187 = arith.constant 0 : index
    %c0_188 = arith.constant 0 : index
    %258 = vector.load %arg16[%c0_187, %c0_188] : memref<16x128xf32, #tpu.memory_space<vmem>>, vector<16x128xf32>
    tpu.vector_store %arg16[%c0_187, %c0_188], %257 {strides = array<i32>} : memref<16x128xf32, #tpu.memory_space<vmem>>, vector<16x128xf32>,
    return
  }
}

</mosaic_0001>

<bundles_post_ra>
// kernel: forward.1
= control target key start
LH: loop header
LB: loop body
LE: loop exit
PB: predicated region body
PF: predicated region fallthrough
CT: control target
= control target key end

     0   :  { %vm62_vm0 = vcmask 1042432   ;;  %vm58_vm1 = vcmask 220160   ;;  %v810_v10 = vmov 0   ;;  %s811_s20 = smov 127   ;;  %s812_s21 = smov 121   ;;  %vm203_vm5 = vcmask 588800   ;;  %s1146_s0 = inlined_call_operand.vmem [shape: f32[27,128], index: 0, kind: input, shape index: {}]   ;;  %s1147_s4 = inlined_call_operand.vmem [shape: f32[8,27], index: 4, kind: input, shape index: {}]   ;;  %s1148_s8 = inlined_call_operand.vmem [shape: f32[8,1], index: 8, kind: input, shape index: {}]   ;;  %s1149_s9 = inlined_call_operand.vmem [shape: f32[8,1], index: 9, kind: input, shape index: {}]   ;;  %s1150_s1 = inlined_call_operand.vmem [shape: f32[9,1,128], index: 1, kind: input, shape index: {}]   ;;  %s1151_s5 = inlined_call_operand.vmem [shape: f32[8,72], index: 5, kind: input, shape index: {}]   ;;  %s1152_s10 = inlined_call_operand.vmem [shape: f32[8,1], index: 10, kind: input, shape index: {}]   ;;  %s1153_s11 = inlined_call_operand.vmem [shape: f32[8,1], index: 11, kind: input, shape index: {}]   ;;  %s1154_s6 = inlined_call_operand.vmem [shape: f32[16,72], index: 6, kind: input, shape index: {}]   ;;  %s1155_s13 = inlined_call_operand.vmem [shape: f32[16,1], index: 13, kind: input, shape index: {}]   ;;  %s1156_s12 = inlined_call_operand.vmem [shape: f32[16,1], index: 12, kind: input, shape index: {}]   ;;  %s1157_s2 = inlined_call_operand.vmem [shape: f32[128,128], index: 2, kind: input, shape index: {}]   ;;  %s1158_s7 = inlined_call_operand.vmem [shape: f32[16,144], index: 7, kind: input, shape index: {}]   ;;  %s1159_s3 = inlined_call_operand.vmem [shape: f32[1,128], index: 3, kind: input, shape index: {}]   ;;  %s1160_s15 = inlined_call_operand.vmem [shape: f32[16,1], index: 15, kind: input, shape index: {}]   ;;  %s1161_s14 = inlined_call_operand.vmem [shape: f32[16,1], index: 14, kind: input, shape index: {}]   ;;  %s1162_s16 = inlined_call_operand.vmem [shape: f32[16,128], index: 16, kind: output, shape index: {}]  }
   0x1   :  { %1164 = sst [smem:[#allocation3_spill]] %s1146_s0  ;;  %v53_v4 = vld [vmem:[%s1147_s4] sm:$0xff]  ;;  %770 = vset.pattern.permute.xlu1 %v810_v10  ;;  %771 = vset.pattern.permute.xlu0 %v810_v10  ;;  %s814_s22 = smov 7   ;;  %v773_v29 = vld [vmem:[%s1150_s1 + $0x8] ss:$0 sm:$0xff]  ;;  %vm557_vm15 = vcmask 130048  }
   0x2   :  { %s1165_s23 = sld [smem:[#allocation3_spill]]  ;;  %772 = vset.pattern.permute.xlu2 %v810_v10  ;;  %v94_v19 = vld [vmem:[%s1148_s8] sm:$0xff]  ;;  %s813_s8 = smov 119  }
   0x3   :  { %v113_v23 = vld [vmem:[%s1149_s9] sm:$0xff]  ;;  %s816_s9 = smov 9   ;;  %s817_s24 = smov 1  }
   0x4   :  { %s818_s25 = smov 8   ;;  %v774_v32 = vld [vmem:[%s1150_s1 + $0x7] ss:$0 sm:$0xff]  ;;  %v777_v35 = vld [vmem:[%s1150_s1 + $0x6] ss:$0 sm:$0xff] }
   0x5   :  { %v776_v37 = vld [vmem:[%s1150_s1 + $0x5] ss:$0 sm:$0xff]  ;;  %v775_v41 = vld [vmem:[%s1150_s1 + $0x3] ss:$0 sm:$0xff]  ;;  %v779_v43 = vld [vmem:[%s1150_s1 + $0x2] ss:$0 sm:$0xff] }
   0x6   :  { %v778_v45 = vld [vmem:[%s1150_s1 + $0x1] ss:$0 sm:$0xff]  ;;  %v780_v50 = vld [vmem:[%s1150_s1] ss:$0 sm:$0xff] }
   0x7   :  { %v193_v53 = vld [vmem:[%s1151_s5] sm:$0xff] }
   0x8   :  { %v57_v0 = vld [vmem:[%s1165_s23 + $0x18] sm:$0x7]  ;;  %v56_v1 = vld [vmem:[%s1165_s23 + $0x10] sm:$0xff]  ;;  %v55_v2 = vld [vmem:[%s1165_s23 + $0x8] sm:$0xff] }
   0x9   :  { %733 = vmatpush.msk.msra.mxu2 %vm62_vm0, %v57_v0  ;;  %v54_v3 = vld [vmem:[%s1165_s23] sm:$0xff]  ;;  %s815_s23 = smov 120  }
   0xb   :  { %79 = vmatpush.msra.mxu2 %v56_v1 }
   0xd   :  { %80 = vmatpush.msra.mxu2 %v55_v2 }
   0xf   :  { %81 = vmatpush.msra.mxu2 %v54_v3  ;;  %v235_v3 = vld [vmem:[%s1152_s10] sm:$0xff] }
  0x10   :  { %734 = vmatmul.msk.f32.vlgmr.msra.gmra.mxu2 %vm58_vm1, %v53_v4 }
  0x93   :  { %v83_v5 = vpop.f32.mrf.mxu2 }
  0x94   :  { %86 = vadd.xlane.f32.xlu0 %v83_v5 }
 0x107   :  { %v87_v6 = vpop.xlane.xlu0 %86 }
 0x108   :  { %v88_v7 = vmul.f32 0.0078125, %v87_v6 }
 0x10a   :  { %v89_v8 = vsub.f32 %v83_v5, %v88_v7  ;;  %v254_v7 = vld [vmem:[%s1153_s11] sm:$0xff] }
 0x10c   :  { %v90_v9 = vmul.f32 %v89_v8, %v89_v8 }
 0x10e   :  { %91 = vadd.xlane.f32.xlu0 %v90_v9 }
 0x181   :  { %v92_v11 = vpop.xlane.xlu0 %91 }
 0x182   :  { %v93_v12 = vmul.f32 0.0078125, %v92_v11 }
 0x184   :  { %v95_v13 = vadd.f32 1e-05, %v93_v12 }
 0x186   :  { %798 = vrsqrt.f32 %v95_v13  ;;  %vm102_vm3 = vweird.f32 %v95_v13 }
 0x18c   :  { %v799_v14 = vpop.eup %798 }
 0x18d   :  { %v97_v15 = vmul.f32 %v799_v14, %v95_v13  ;;  %vm103_vm2 = vweird.f32 %v799_v14  ;;  %v783_v13 = vld [vmem:[%s1150_s1 + $0x8] ss:$0 sm:$0xff] }
 0x18e   :  { %vm104_vm4 = vmor %vm102_vm3, %vm103_vm2 }
 0x18f   :  { %v98_v16 = vmul.f32 %v799_v14, %v97_v15 }
 0x191   :  { %v99_v17 = vmul.f32 0.5, %v98_v16  ;;  %v784_v16 = vld [vmem:[%s1150_s1 + $0x7] ss:$0 sm:$0xff] }
 0x193   :  { %v100_v18 = vsub.f32 1.5, %v99_v17 }
 0x195   :  { %v101_v20 = vmul.f32 %v799_v14, %v100_v18 }
 0x197   :  { %v105_v21 = vsel %vm104_vm4, %v799_v14, %v101_v20  ;;  %v781_v20 = vld [vmem:[%s1150_s1 + $0x5] ss:$0 sm:$0xff] }
 0x198   :  { %v106_v22 = vmul.f32 %v105_v21, %v94_v19  ;;  %v785_v19 = vld [vmem:[%s1150_s1 + $0x6] ss:$0 sm:$0xff] }
 0x19a   :  { %109 = vperm.xlu1 %770, %v106_v22  }
 0x1a2   :  { %116 = vperm.xlu1 %770, %v113_v23  }
 0x20c   :  { %v110_v24 = vpop.permute.xlu1 %109 }
 0x20d   :  { %v112_v25 = vmul.f32 %v110_v24, %v89_v8 }
 0x214   :  { %v117_v26 = vpop.permute.xlu1 %116 }
 0x215   :  { %v119_v27 = vadd.f32 %v117_v26, %v112_v25  ;;  %v782_v25 = vld [vmem:[%s1150_s1 + $0x3] ss:$0 sm:$0xff] }
 0x217   :  { %v120_v28 = vmax.f32 %v119_v27, 0.0  ;;  %v786_v27 = vld [vmem:[%s1150_s1 + $0x2] ss:$0 sm:$0xff] }
 0x219   :  { %157 = vrot.lane.b32.xlu1 %v120_v28, %s811_s20  ;;  %166 = vrot.lane.b32.xlu0 %v120_v28, %s812_s21 }
 0x21a   :  { %184 = vrot.lane.b32.xlu2 %v120_v28, %s813_s8 }
 0x221   :  { %138 = vrot.lane.b32.xlu1 %v120_v28, %s814_s22 }
 0x222   :  { %175 = vrot.lane.b32.xlu2 %v120_v28, %s815_s23 }
 0x229   :  { %121 = vrot.lane.b32.xlu1 %v120_v28, %s816_s9 }
 0x22a   :  { %147 = vrot.lane.b32.xlu2 %v120_v28, %s817_s24 }
 0x232   :  { %129 = vrot.lane.b32.xlu2 %v120_v28, %s818_s25 }
 0x274   :  { %v185_v30 = vpop.permute.xlu2 %184 }
 0x275   :  { %v191_v31 = vmul.f32 %v773_v29, %v185_v30 }
 0x277   :  { %214 = vmatpush.msra.mxu1 %v191_v31  ;;  %v787_v31 = vld [vmem:[%s1150_s1 + $0x1] ss:$0 sm:$0xff] }
 0x27c   :  { %v176_v33 = vpop.permute.xlu2 %175 }
 0x27d   :  { %v182_v34 = vmul.f32 %v774_v32, %v176_v33 }
 0x27f   :  { %215 = vmatpush.msra.mxu1 %v182_v34  ;;  %v788_v34 = vld [vmem:[%s1150_s1] ss:$0 sm:$0xff] }
 0x284   :  { %v148_v36 = vpop.permute.xlu2 %147 }
 0x285   :  { %v154_v44 = vmul.f32 %v775_v41, %v148_v36 }
 0x28b   :  { %v158_v38 = vpop.permute.xlu1 %157  ;;  %v167_v39 = vpop.permute.xlu0 %166 }
 0x28c   :  { %v173_v40 = vmul.f32 %v777_v35, %v167_v39  ;;  %v164_v42 = vmul.f32 %v776_v37, %v158_v38  ;;  %v130_v46 = vpop.permute.xlu2 %129  ;;  %v327_v37 = vld [vmem:[%s1154_s6] sm:$0xff]  ;;  %v328_v38 = vld [vmem:[%s1154_s6 + $0x8] sm:$0xff] }
 0x28d   :  { %v136_v49 = vmul.f32 %v778_v45, %v130_v46 }
 0x28e   :  { %216 = vmatpush.msra.mxu1 %v173_v40 }
 0x290   :  { %217 = vmatpush.msra.mxu1 %v164_v42 }
 0x292   :  { %218 = vmatpush.msra.mxu1 %v120_v28 }
 0x293   :  { %v139_v47 = vpop.permute.xlu1 %138 }
 0x294   :  { %v145_v48 = vmul.f32 %v779_v43, %v139_v47  ;;  %219 = vmatpush.msra.mxu1 %v154_v44 }
 0x296   :  { %220 = vmatpush.msra.mxu1 %v145_v48 }
 0x298   :  { %221 = vmatpush.msra.mxu1 %v136_v49 }
 0x29b   :  { %v122_v51 = vpop.permute.xlu1 %121 }
 0x29c   :  { %v127_v52 = vmul.f32 %v780_v50, %v122_v51  ;;  %v422_v51 = vld [vmem:[%s1155_s13 + $0x8] sm:$0xff] }
 0x29e   :  { %222 = vmatpush.msra.mxu1 %v127_v52 }
 0x29f   :  { %742 = vmatmul.msk.f32.vlgmr.msra.gmra.mxu1 %vm203_vm5, %v193_v53  ;;  %v421_v53 = vld [vmem:[%s1155_s13] sm:$0xff] }
 0x31c   :  { %v224_v54 = vpop.f32.mrf.mxu1 }
 0x31d   :  { %227 = vadd.xlane.f32.xlu2 %v224_v54 }
 0x390   :  { %v228_v55 = vpop.xlane.xlu2 %227 }
 0x391   :  { %v229_v56 = vmul.f32 0.0078125, %v228_v55 }
 0x393   :  { %v230_v57 = vsub.f32 %v224_v54, %v229_v56 }
 0x395   :  { %v231_v58 = vmul.f32 %v230_v57, %v230_v57 }
 0x397   :  { %232 = vadd.xlane.f32.xlu0 %v231_v58 }
 0x40a   :  { %v233_v59 = vpop.xlane.xlu0 %232 }
 0x40b   :  { %v234_v60 = vmul.f32 0.0078125, %v233_v59 }
 0x40d   :  { %v236_v61 = vadd.f32 1e-05, %v234_v60 }
 0x40f   :  { %800 = vrsqrt.f32 %v236_v61  ;;  %vm243_vm7 = vweird.f32 %v236_v61 }
 0x415   :  { %v801_v62 = vpop.eup %800 }
 0x416   :  { %v238_v63 = vmul.f32 %v801_v62, %v236_v61  ;;  %vm244_vm6 = vweird.f32 %v801_v62 }
 0x417   :  { %vm245_vm8 = vmor %vm243_vm7, %vm244_vm6 }
 0x418   :  { %v239_v0 = vmul.f32 %v801_v62, %v238_v63 }
 0x41a   :  { %v240_v1 = vmul.f32 0.5, %v239_v0  ;;  %v383_v0 = vld [vmem:[%s1156_s12] sm:$0xff] }
 0x41c   :  { %v241_v2 = vsub.f32 1.5, %v240_v1 }
 0x41e   :  { %v242_v4 = vmul.f32 %v801_v62, %v241_v2 }
 0x420   :  { %v246_v5 = vsel %vm245_vm8, %v801_v62, %v242_v4 }
 0x421   :  { %v247_v6 = vmul.f32 %v246_v5, %v235_v3 }
 0x423   :  { %250 = vperm.xlu1 %770, %v247_v6  }
 0x42b   :  { %257 = vperm.xlu1 %770, %v254_v7   ;;  %v384_v7 = vld [vmem:[%s1156_s12 + $0x8] sm:$0xff] }
 0x495   :  { %v251_v8 = vpop.permute.xlu1 %250 }
 0x496   :  { %v253_v9 = vmul.f32 %v251_v8, %v230_v57 }
 0x49d   :  { %v258_v10 = vpop.permute.xlu1 %257 }
 0x49e   :  { %v260_v11 = vadd.f32 %v258_v10, %v253_v9 }
 0x4a0   :  { %v261_v12 = vmax.f32 %v260_v11, 0.0 }
 0x4a2   :  { %286 = vrot.lane.b32.xlu0 %v261_v12, %s817_s24  ;;  %295 = vrot.lane.b32.xlu2 %v261_v12, %s811_s20 }
 0x4a3   :  { %319 = vrot.lane.b32.xlu1 %v261_v12, %s813_s8 }
 0x4ab   :  { %311 = vrot.lane.b32.xlu1 %v261_v12, %s815_s23 }
 0x4b3   :  { %303 = vrot.lane.b32.xlu1 %v261_v12, %s812_s21 }
 0x4bb   :  { %278 = vrot.lane.b32.xlu1 %v261_v12, %s814_s22 }
 0x4c3   :  { %270 = vrot.lane.b32.xlu1 %v261_v12, %s818_s25 }
 0x4cb   :  { %262 = vrot.lane.b32.xlu1 %v261_v12, %s816_s9 }
 0x4fc   :  { %v296_v21 = vpop.permute.xlu2 %295 }
 0x4fd   :  { %v301_v24 = vmul.f32 %v781_v20, %v296_v21 }
 0x514   :  { %v287_v26 = vpop.permute.xlu0 %286 }
 0x515   :  { %v320_v14 = vpop.permute.xlu1 %319  ;;  %v292_v28 = vmul.f32 %v782_v25, %v287_v26 }
 0x516   :  { %v325_v15 = vmul.f32 %v783_v13, %v320_v14 }
 0x518   :  { %351 = vmatpush.msrb.mxu2 %v325_v15 }
 0x51d   :  { %v312_v17 = vpop.permute.xlu1 %311 }
 0x51e   :  { %v317_v18 = vmul.f32 %v784_v16, %v312_v17 }
 0x520   :  { %352 = vmatpush.msrb.mxu2 %v317_v18 }
 0x525   :  { %v304_v22 = vpop.permute.xlu1 %303 }
 0x526   :  { %v309_v23 = vmul.f32 %v785_v19, %v304_v22  ;;  %v789_v22 = vld [vmem:[%s1150_s1 + $0x7] ss:$0 sm:$0xff] }
 0x528   :  { %353 = vmatpush.msrb.mxu2 %v309_v23 }
 0x52a   :  { %354 = vmatpush.msrb.mxu2 %v301_v24 }
 0x52c   :  { %355 = vmatpush.msrb.mxu2 %v261_v12 }
 0x52d   :  { %v279_v29 = vpop.permute.xlu1 %278 }
 0x52e   :  { %v284_v30 = vmul.f32 %v786_v27, %v279_v29  ;;  %356 = vmatpush.msrb.mxu2 %v292_v28  ;;  %v792_v28 = vld [vmem:[%s1150_s1 + $0x6] ss:$0 sm:$0xff] }
 0x530   :  { %357 = vmatpush.msrb.mxu2 %v284_v30  ;;  %v790_v30 = vld [vmem:[%s1150_s1 + $0x5] ss:$0 sm:$0xff] }
 0x535   :  { %v271_v32 = vpop.permute.xlu1 %270 }
 0x536   :  { %v276_v33 = vmul.f32 %v787_v31, %v271_v32 }
 0x538   :  { %358 = vmatpush.msrb.mxu2 %v276_v33 }
 0x53d   :  { %v263_v35 = vpop.permute.xlu1 %262 }
 0x53e   :  { %v268_v36 = vmul.f32 %v788_v34, %v263_v35 }
 0x540   :  { %359 = vmatpush.msrb.mxu2 %v268_v36 }
 0x541   :  { %750 = vmatmul.msk.f32.vlgmr.msrb.gmra.mxu2 %vm203_vm5, %v327_v37 }
 0x549   :  { %751 = vmatmul.msk.f32.gmra.mxu2 %vm203_vm5, %v328_v38 }
 0x5c4   :  { %v361_v39 = vpop.f32.mrf.mxu2 }
 0x5c5   :  { %367 = vadd.xlane.f32.xlu0 %v361_v39 }
 0x5cc   :  { %v364_v40 = vpop.f32.mrf.mxu2 }
 0x5cd   :  { %369 = vadd.xlane.f32.xlu2 %v364_v40 }
 0x638   :  { %v368_v41 = vpop.xlane.xlu0 %367 }
 0x639   :  { %v371_v42 = vmul.f32 0.0078125, %v368_v41  ;;  %v624_v41 = vld [vmem:[%s1157_s2 + $0x70] sm:$0xff] }
 0x63b   :  { %v373_v43 = vsub.f32 %v361_v39, %v371_v42  ;;  %v791_v39 = vld [vmem:[%s1150_s1 + $0x3] ss:$0 sm:$0xff] }
 0x63d   :  { %v375_v44 = vmul.f32 %v373_v43, %v373_v43 }
 0x63f   :  { %377 = vadd.xlane.f32.xlu2 %v375_v44 }
 0x640   :  { %v370_v45 = vpop.xlane.xlu2 %369 }
 0x641   :  { %v372_v46 = vmul.f32 0.0078125, %v370_v45  ;;  %v623_v45 = vld [vmem:[%s1157_s2 + $0x68] sm:$0xff] }
 0x643   :  { %v374_v47 = vsub.f32 %v364_v40, %v372_v46  ;;  %v625_v40 = vld [vmem:[%s1157_s2 + $0x78] sm:$0xff] }
 0x644   :  { %626 = vmatpush.msra.mxu0 %v625_v40 }
 0x645   :  { %v376_v48 = vmul.f32 %v374_v47, %v374_v47 }
 0x646   :  { %627 = vmatpush.msra.mxu0 %v624_v41 }
 0x647   :  { %379 = vadd.xlane.f32.xlu1 %v376_v48  ;;  %v622_v48 = vld [vmem:[%s1157_s2 + $0x60] sm:$0xff] }
 0x648   :  { %628 = vmatpush.msra.mxu0 %v623_v45 }
 0x64a   :  { %629 = vmatpush.msra.mxu0 %v622_v48 }
 0x657   :  { %430 = vperm.xlu2 %772, %v422_v51   ;;  %v621_v51 = vld [vmem:[%s1157_s2 + $0x58] sm:$0xff] }
 0x658   :  { %630 = vmatpush.msra.mxu0 %v621_v51 }
 0x65f   :  { %425 = vperm.xlu2 %772, %v421_v53  }
 0x6b2   :  { %v378_v49 = vpop.xlane.xlu2 %377 }
 0x6b3   :  { %v381_v50 = vmul.f32 0.0078125, %v378_v49  ;;  %v793_v49 = vld [vmem:[%s1150_s1 + $0x1] ss:$0 sm:$0xff] }
 0x6b5   :  { %v385_v52 = vadd.f32 1e-05, %v381_v50 }
 0x6b7   :  { %802 = vrsqrt.f32 %v385_v52  ;;  %vm393_vm10 = vweird.f32 %v385_v52 }
 0x6ba   :  { %v380_v54 = vpop.xlane.xlu1 %379  ;;  %v431_v11 = vpop.permute.xlu2 %430 }
 0x6bb   :  { %v382_v55 = vmul.f32 0.0078125, %v380_v54  ;;  %v620_v54 = vld [vmem:[%s1157_s2 + $0x50] sm:$0xff] }
 0x6bc   :  { %631 = vmatpush.msra.mxu0 %v620_v54 }
 0x6bd   :  { %v803_v56 = vpop.eup %802  ;;  %v386_v57 = vadd.f32 1e-05, %v382_v55 }
 0x6be   :  { %v388_v58 = vmul.f32 %v803_v56, %v385_v52  ;;  %vm394_vm9 = vweird.f32 %v803_v56 }
 0x6bf   :  { %804 = vrsqrt.f32 %v386_v57  ;;  %vm395_vm11 = vmor %vm393_vm10, %vm394_vm9  ;;  %vm403_vm13 = vweird.f32 %v386_v57 }
 0x6c0   :  { %v389_v59 = vmul.f32 %v803_v56, %v388_v58  ;;  %v794_v58 = vld [vmem:[%s1150_s1] ss:$0 sm:$0xff] }
 0x6c2   :  { %v390_v60 = vmul.f32 0.5, %v389_v59  ;;  %v426_v13 = vpop.permute.xlu2 %425 }
 0x6c4   :  { %v391_v61 = vsub.f32 1.5, %v390_v60 }
 0x6c5   :  { %v805_v62 = vpop.eup %804 }
 0x6c6   :  { %v398_v63 = vmul.f32 %v805_v62, %v386_v57  ;;  %v392_v1 = vmul.f32 %v803_v56, %v391_v61  ;;  %vm404_vm12 = vweird.f32 %v805_v62  ;;  %v619_v57 = vld [vmem:[%s1157_s2 + $0x48] sm:$0xff]  ;;  %v618_v61 = vld [vmem:[%s1157_s2 + $0x40] sm:$0xff] }
 0x6c7   :  { %vm405_vm14 = vmor %vm403_vm13, %vm404_vm12  ;;  %632 = vmatpush.msra.mxu0 %v619_v57  ;;  %v672_v57 = vld [vmem:[%s1161_s14 + $0x8] sm:$0xff] }
 0x6c8   :  { %v399_v2 = vmul.f32 %v805_v62, %v398_v63  ;;  %v396_v3 = vsel %vm395_vm11, %v803_v56, %v392_v1  ;;  %v617_v63 = vld [vmem:[%s1157_s2 + $0x38] sm:$0xff]  ;;  %v535_v1 = vld [vmem:[%s1158_s7] sm:$0xff] }
 0x6c9   :  { %v407_v4 = vmul.f32 %v396_v3, %v383_v0  ;;  %633 = vmatpush.msra.mxu0 %v618_v61  ;;  %v796_v3 = vld [vmem:[%s1150_s1 + $0x8] ss:$0 sm:$0xff] }
 0x6ca   :  { %v400_v5 = vmul.f32 0.5, %v399_v2  ;;  %v616_v2 = vld [vmem:[%s1157_s2 + $0x30] sm:$0xff]  ;;  %v710_v61 = vld [vmem:[%s1160_s15 + $0x8] sm:$0xff] }
 0x6cb   :  { %411 = vperm.xlu1 %770, %v407_v4   ;;  %634 = vmatpush.msra.mxu0 %v617_v63 }
 0x6cc   :  { %v401_v6 = vsub.f32 1.5, %v400_v5 }
 0x6cd   :  { %635 = vmatpush.msra.mxu0 %v616_v2 }
 0x6ce   :  { %v402_v8 = vmul.f32 %v805_v62, %v401_v6  ;;  %v615_v6 = vld [vmem:[%s1157_s2 + $0x28] sm:$0xff] }
 0x6cf   :  { %636 = vmatpush.msra.mxu0 %v615_v6 }
 0x6d0   :  { %v406_v9 = vsel %vm405_vm14, %v805_v62, %v402_v8  ;;  %v614_v8 = vld [vmem:[%s1157_s2 + $0x20] sm:$0xff] }
 0x6d1   :  { %v408_v10 = vmul.f32 %v406_v9, %v384_v7  ;;  %637 = vmatpush.msra.mxu0 %v614_v8 }
 0x6d3   :  { %416 = vperm.xlu0 %771, %v408_v10   ;;  %v536_v10 = vld [vmem:[%s1158_s7 + $0x8] sm:$0xff] }
 0x73d   :  { %v412_v12 = vpop.permute.xlu1 %411 }
 0x73e   :  { %v419_v14 = vmul.f32 %v412_v12, %v373_v43  ;;  %v537_v12 = vld [vmem:[%s1158_s7 + $0x10] sm:$0xff] }
 0x740   :  { %v433_v15 = vadd.f32 %v426_v13, %v419_v14  ;;  %v612_v13 = vld [vmem:[%s1157_s2 + $0x10] sm:$0xff]  ;;  %v538_v14 = vld [vmem:[%s1158_s7 + $0x18] sm:$0xff] }
 0x742   :  { %v435_v16 = vmax.f32 %v433_v15, 0.0  ;;  %v611_v15 = vld [vmem:[%s1157_s2 + $0x8] sm:$0xff] }
 0x744   :  { %499 = vrot.lane.b32.xlu0 %v435_v16, %s812_s21  ;;  %511 = vrot.lane.b32.xlu2 %v435_v16, %s815_s23 }
 0x745   :  { %v417_v17 = vpop.permute.xlu0 %416 }
 0x746   :  { %v420_v18 = vmul.f32 %v417_v17, %v374_v47  ;;  %v795_v47 = vld [vmem:[%s1150_s1 + $0x2] ss:$0 sm:$0xff] }
 0x748   :  { %v434_v19 = vadd.f32 %v431_v11, %v420_v18  ;;  %v613_v11 = vld [vmem:[%s1157_s2 + $0x18] sm:$0xff] }
 0x749   :  { %638 = vmatpush.msra.mxu0 %v613_v11 }
 0x74a   :  { %v436_v20 = vmax.f32 %v434_v19, 0.0 }
 0x74b   :  { %639 = vmatpush.msra.mxu0 %v612_v13 }
 0x74c   :  { %513 = vrot.lane.b32.xlu1 %v436_v20, %s815_s23  ;;  %475 = vrot.lane.b32.xlu0 %v436_v20, %s817_s24 }
 0x74d   :  { %489 = vrot.lane.b32.xlu2 %v436_v20, %s811_s20  ;;  %640 = vmatpush.msra.mxu0 %v611_v15 }
 0x754   :  { %501 = vrot.lane.b32.xlu1 %v436_v20, %s812_s21  ;;  %461 = vrot.lane.b32.xlu0 %v435_v16, %s814_s22 }
 0x755   :  { %473 = vrot.lane.b32.xlu2 %v435_v16, %s817_s24 }
 0x75c   :  { %487 = vrot.lane.b32.xlu1 %v435_v16, %s811_s20  ;;  %439 = vrot.lane.b32.xlu0 %v436_v20, %s816_s9 }
 0x75d   :  { %451 = vrot.lane.b32.xlu2 %v436_v20, %s818_s25 }
 0x764   :  { %463 = vrot.lane.b32.xlu1 %v436_v20, %s814_s22  ;;  %523 = vrot.lane.b32.xlu0 %v435_v16, %s813_s8 }
 0x765   :  { %437 = vrot.lane.b32.xlu2 %v435_v16, %s816_s9 }
 0x76c   :  { %449 = vrot.lane.b32.xlu1 %v435_v16, %s818_s25 }
 0x774   :  { %525 = vrot.lane.b32.xlu1 %v436_v20, %s813_s8 }
 0x79e   :  { %v512_v21 = vpop.permute.xlu2 %511 }
 0x79f   :  { %v519_v26 = vmul.f32 %v789_v22, %v512_v21 }
 0x7a7   :  { %v490_v27 = vpop.permute.xlu2 %489 }
 0x7a8   :  { %v496_v34 = vmul.f32 %v790_v30, %v490_v27  ;;  %v1122_v27 = vld [vmem:[%s1159_s3] ss:$0 sm:$0xff] }
 0x7af   :  { %v474_v35 = vpop.permute.xlu2 %473 }
 0x7b0   :  { %v481_v46 = vmul.f32 %v791_v39, %v474_v35 }
 0x7b6   :  { %v500_v23 = vpop.permute.xlu0 %499 }
 0x7b7   :  { %v507_v33 = vmul.f32 %v792_v28, %v500_v23  ;;  %v452_v43 = vpop.permute.xlu2 %451 }
 0x7b8   :  { %v458_v55 = vmul.f32 %v793_v49, %v452_v43 }
 0x7be   :  { %v514_v24 = vpop.permute.xlu1 %513  ;;  %v476_v32 = vpop.permute.xlu0 %475 }
 0x7bf   :  { %v520_v25 = vmul.f32 %v789_v22, %v514_v24  ;;  %v482_v42 = vmul.f32 %v791_v39, %v476_v32  ;;  %v438_v60 = vpop.permute.xlu2 %437 }
 0x7c0   :  { %v445_v0 = vmul.f32 %v794_v58, %v438_v60 }
 0x7c1   :  { %564 = vmatpush.msra.mxu3 %v520_v25 }
 0x7c3   :  { %565 = vmatpush.msra.mxu3 %v519_v26 }
 0x7c6   :  { %v502_v29 = vpop.permute.xlu1 %501  ;;  %v462_v38 = vpop.permute.xlu0 %461 }
 0x7c7   :  { %v508_v31 = vmul.f32 %v792_v28, %v502_v29  ;;  %v469_v52 = vmul.f32 %v795_v47, %v462_v38 }
 0x7c9   :  { %566 = vmatpush.msra.mxu3 %v508_v31 }
 0x7cb   :  { %567 = vmatpush.msra.mxu3 %v507_v33 }
 0x7cd   :  { %568 = vmatpush.msra.mxu3 %v496_v34 }
 0x7ce   :  { %v488_v36 = vpop.permute.xlu1 %487  ;;  %v440_v53 = vpop.permute.xlu0 %439 }
 0x7cf   :  { %v495_v37 = vmul.f32 %v790_v30, %v488_v36  ;;  %v446_v62 = vmul.f32 %v794_v58, %v440_v53  ;;  %v709_v36 = vld [vmem:[%s1160_s15] sm:$0xff] }
 0x7d1   :  { %569 = vmatpush.msra.mxu3 %v495_v37 }
 0x7d3   :  { %570 = vmatpush.msra.mxu3 %v436_v20 }
 0x7d5   :  { %571 = vmatpush.msra.mxu3 %v435_v16  ;;  %v610_v16 = vld [vmem:[%s1157_s2] sm:$0xff] }
 0x7d6   :  { %v464_v44 = vpop.permute.xlu1 %463  ;;  %v524_v4 = vpop.permute.xlu0 %523  ;;  %641 = vmatpush.msra.mxu0 %v610_v16 }
 0x7d7   :  { %572 = vmatpush.msra.mxu3 %v482_v42  ;;  %v470_v50 = vmul.f32 %v795_v47, %v464_v44  ;;  %v531_v9 = vmul.f32 %v796_v3, %v524_v4 }
 0x7d9   :  { %573 = vmatpush.msra.mxu3 %v481_v46 }
 0x7db   :  { %574 = vmatpush.msra.mxu3 %v470_v50  ;;  %v671_v50 = vld [vmem:[%s1161_s14] sm:$0xff] }
 0x7dd   :  { %575 = vmatpush.msra.mxu3 %v469_v52 }
 0x7de   :  { %v450_v56 = vpop.permute.xlu1 %449 }
 0x7df   :  { %v457_v59 = vmul.f32 %v793_v49, %v450_v56  ;;  %576 = vmatpush.msra.mxu3 %v458_v55 }
 0x7e1   :  { %577 = vmatpush.msra.mxu3 %v457_v59 }
 0x7e3   :  { %578 = vmatpush.msra.mxu3 %v446_v62 }
 0x7e5   :  { %579 = vmatpush.msra.mxu3 %v445_v0 }
 0x7e6   :  { %v526_v5 = vpop.permute.xlu1 %525  ;;  %580 = vmatmul.f32.vlgmr.msra.gmra.mxu3 %v535_v1 }
 0x7e7   :  { %v532_v7 = vmul.f32 %v796_v3, %v526_v5 }
 0x7e9   :  { %601 = vmatpush.msrb.mxu1 %v532_v7 }
 0x7eb   :  { %602 = vmatpush.msrb.mxu1 %v531_v9 }
 0x7ec   :  { %759 = vmatmul.msk.f32.vlgmr.msrb.gmra.mxu1 %vm557_vm15, %v536_v10 }
 0x7ee   :  { %583 = vmatmul.f32.gmra.mxu3 %v537_v12 }
 0x7f4   :  { %760 = vmatmul.msk.f32.gmra.mxu1 %vm557_vm15, %v538_v14 }
 0x869   :  { %v581_v17 = vpop.f32.mrf.mxu3  ;;  %v604_v18 = vpop.f32.mrf.mxu1 }
 0x86a   :  { %v605_v19 = vadd.f32 %v604_v18, %v581_v17 }
 0x86c   :  { %642 = vmatmul.f32.vlgmr.msra.gmra.mxu0 %v605_v19 }
 0x871   :  { %v584_v20 = vpop.f32.mrf.mxu3  ;;  %v607_v21 = vpop.f32.mrf.mxu1 }
 0x872   :  { %v608_v22 = vadd.f32 %v607_v21, %v584_v20 }
 0x874   :  { %645 = vmatmul.f32.gmra.mxu0 %v608_v22 }
 0x8e9   :  { %v643_v23 = vpop.f32.mrf.mxu0 }
 0x8ea   :  { %650 = vadd.xlane.f32.xlu2 %v643_v23 }
 0x8f1   :  { %v646_v24 = vpop.f32.mrf.mxu0 }
 0x8f2   :  { %652 = vadd.xlane.f32.xlu1 %v646_v24 }
 0x95d   :  { %v651_v25 = vpop.xlane.xlu2 %650 }
 0x95e   :  { %v654_v26 = vmul.f32 0.03125, %v651_v25 }
 0x960   :  { %v656_v28 = vsub.f32 %v643_v23, %v654_v26 }
 0x962   :  { %v661_v29 = vmul.f32 %v1122_v27, %v656_v28 }
 0x964   :  { %v663_v30 = vmul.f32 %v661_v29, %v661_v29 }
 0x965   :  { %v653_v31 = vpop.xlane.xlu1 %652 }
 0x966   :  { %v655_v32 = vmul.f32 0.03125, %v653_v31  ;;  %665 = vadd.xlane.f32.xlu0 %v663_v30 }
 0x968   :  { %v657_v33 = vsub.f32 %v646_v24, %v655_v32 }
 0x96a   :  { %v662_v34 = vmul.f32 %v1122_v27, %v657_v33 }
 0x96c   :  { %v664_v35 = vmul.f32 %v662_v34, %v662_v34 }
 0x96e   :  { %667 = vadd.xlane.f32.xlu2 %v664_v35 }
 0x986   :  { %713 = vperm.xlu2 %772, %v709_v36  }
 0x9d9   :  { %v666_v37 = vpop.xlane.xlu0 %665 }
 0x9da   :  { %v669_v38 = vmul.f32 0.03125, %v666_v37 }
 0x9dc   :  { %v673_v39 = vadd.f32 1e-05, %v669_v38 }
 0x9de   :  { %806 = vrsqrt.f32 %v673_v39  ;;  %vm681_vm1 = vweird.f32 %v673_v39 }
 0x9e1   :  { %v668_v40 = vpop.xlane.xlu2 %667 }
 0x9e2   :  { %v670_v41 = vmul.f32 0.03125, %v668_v40 }
 0x9e4   :  { %v807_v42 = vpop.eup %806  ;;  %v674_v43 = vadd.f32 1e-05, %v670_v41 }
 0x9e5   :  { %v676_v44 = vmul.f32 %v807_v42, %v673_v39  ;;  %vm682_vm0 = vweird.f32 %v807_v42 }
 0x9e6   :  { %808 = vrsqrt.f32 %v674_v43  ;;  %vm683_vm2 = vmor %vm681_vm1, %vm682_vm0  ;;  %vm691_vm4 = vweird.f32 %v674_v43 }
 0x9e7   :  { %v677_v45 = vmul.f32 %v807_v42, %v676_v44 }
 0x9e9   :  { %v678_v46 = vmul.f32 0.5, %v677_v45  ;;  %v714_v0 = vpop.permute.xlu2 %713 }
 0x9eb   :  { %v679_v47 = vsub.f32 1.5, %v678_v46 }
 0x9ec   :  { %v809_v48 = vpop.eup %808 }
 0x9ed   :  { %v686_v49 = vmul.f32 %v809_v48, %v674_v43  ;;  %v680_v51 = vmul.f32 %v807_v42, %v679_v47  ;;  %vm692_vm3 = vweird.f32 %v809_v48 }
 0x9ee   :  { %vm693_vm5 = vmor %vm691_vm4, %vm692_vm3 }
 0x9ef   :  { %v687_v52 = vmul.f32 %v809_v48, %v686_v49  ;;  %v684_v53 = vsel %vm683_vm2, %v807_v42, %v680_v51 }
 0x9f0   :  { %v695_v54 = vmul.f32 %v684_v53, %v671_v50 }
 0x9f1   :  { %v688_v55 = vmul.f32 0.5, %v687_v52 }
 0x9f2   :  { %699 = vperm.xlu1 %770, %v695_v54  }
 0x9f3   :  { %v689_v56 = vsub.f32 1.5, %v688_v55 }
 0x9f5   :  { %v690_v58 = vmul.f32 %v809_v48, %v689_v56 }
 0x9f7   :  { %v694_v59 = vsel %vm693_vm5, %v809_v48, %v690_v58 }
 0x9f8   :  { %v696_v60 = vmul.f32 %v694_v59, %v672_v57 }
 0x9fa   :  { %704 = vperm.xlu0 %771, %v696_v60  }
 0xa02   :  { %718 = vperm.xlu0 %771, %v710_v61  }
 0xa64   :  { %v700_v62 = vpop.permute.xlu1 %699 }
 0xa65   :  { %v707_v63 = vmul.f32 %v700_v62, %v656_v28 }
 0xa67   :  { %v721_v1 = vadd.f32 %v714_v0, %v707_v63 }
 0xa69   :  { %v723_v2 = vmax.f32 %v721_v1, 0.0 }
 0xa6b   :  { %v725_v3 = vmul.f32 %v1122_v27, %v723_v2 }
 0xa6c   :  { %v705_v4 = vpop.permute.xlu0 %704 }
 0xa6d   :  { %727 = vst [vmem:[%s1162_s16] sm:$0xff] %v725_v3  ;;  %v708_v5 = vmul.f32 %v705_v4, %v657_v33 }
 0xa74   :  { %v719_v6 = vpop.permute.xlu0 %718 }
 0xa75   :  { %v722_v7 = vadd.f32 %v719_v6, %v708_v5 }
 0xa77   :  { %v724_v8 = vmax.f32 %v722_v7, 0.0 }
 0xa79   :  { %v726_v9 = vmul.f32 %v1122_v27, %v724_v8 }
 0xa7b   :  { %728 = vst [vmem:[%s1162_s16 + $0x8] sm:$0xff] %v726_v9 }

</bundles_post_ra>
